<compile_context>
chip_gen: v7x
topology: tpu7x:2x2x1
jax: 0.10.0
libtpu: 0.0.40
codegen_flags: <defaults>
</compile_context>

<pallas_src>
import functools

import jax
import jax.numpy as jnp
from jax import lax
from jax.experimental import pallas as pl
from jax.experimental.pallas import tpu as pltpu


def _round_up(n, m):
    return ((n + m - 1) // m) * m


def _cdiv(a, b):
    return (a + b - 1) // b


def _sublane_multiple(dtype):
    # f32 -> 8 rows, bf16 -> 16, int8/bool -> 32 (sublane packing granularity).
    itemsize = max(1, jnp.dtype(dtype).itemsize)
    return max(8, 32 // itemsize)


def _int_pow(b, n):
    """b**n for a static python int n >= 0 via repeated multiplies (VPU only)."""
    if n == 0:
        return jnp.ones_like(b)
    r = None
    p = b
    while n:
        if n & 1:
            r = p if r is None else r * p
        n >>= 1
        if n:
            p = p * p
    return r


def _asl_kernel(x_ref, y_ref, out_ref, *, gamma_neg, gamma_pos, clip, eps,
                tile_b, tile_c, strip, total_rows, needs_mask, fold_lanes,
                binary_targets):
    i = pl.program_id(0)

    gp_int = float(gamma_pos).is_integer() and gamma_pos >= 0
    gn_int = float(gamma_neg).is_integer() and gamma_neg >= 0
    fast = binary_targets and gp_int and gn_int

    def strip_loss(xs, ys):
        # Exact sigmoid: 1 exp + 1 exact divide (approx recip drifted vs torch).
        e = jnp.exp(-xs)
        xs_pos = 1.0 / (1.0 + e)
        xs_neg = 1.0 - xs_pos
        if clip is not None and clip > 0:
            xs_neg = jnp.minimum(xs_neg + clip, 1.0)
        if fast:
            # y in {0,1}: single log, integer-exponent focal weight (VPU mults).
            is_pos = ys > 0.0
            pt = jnp.where(is_pos, xs_pos, xs_neg)
            loss = jnp.log(jnp.maximum(pt, eps))
            if gamma_neg > 0 or gamma_pos > 0:
                base = jnp.maximum(1.0 - pt, 0.0)
                w = jnp.where(is_pos, _int_pow(base, int(gamma_pos)),
                              _int_pow(base, int(gamma_neg)))
                loss = loss * w
        else:
            # General path (soft labels / non-integer gammas): torch form.
            loss = (ys * jnp.log(jnp.maximum(xs_pos, eps))
                    + (1.0 - ys) * jnp.log(jnp.maximum(xs_neg, eps)))
            if gamma_neg > 0 or gamma_pos > 0:
                pt = xs_pos * ys + xs_neg * (1.0 - ys)
                gamma = gamma_pos * ys + gamma_neg * (1.0 - ys)
                base = jnp.maximum(1.0 - pt, 0.0)   # clamp: no NaN from pow
                loss = loss * jnp.power(base, gamma)
        return loss

    def body(s, acc):
        r0 = pl.multiple_of(s * strip, strip)
        xs = x_ref[pl.ds(r0, strip), :].astype(jnp.float32)
        ys = y_ref[pl.ds(r0, strip), :].astype(jnp.float32)
        loss = strip_loss(xs, ys)
        if needs_mask:
            rows = (i * tile_b + r0
                    + lax.broadcasted_iota(jnp.int32, loss.shape, 0))
            loss = jnp.where(rows < total_rows, loss, 0.0)
        # Fold the strip into an (8, tile_c) partial sum (pure VPU adds).
        return acc + loss.reshape(strip // 8, 8, tile_c).sum(axis=0)

    n_strips = tile_b // strip
    acc = lax.fori_loop(0, n_strips, body,
                        jnp.zeros((8, tile_c), jnp.float32),
                        unroll=(n_strips <= 8))
    if fold_lanes:
        # (8, tile_c) -> (8, 128): vreg + vreg adds, keeps output block tiny.
        acc = acc.reshape(8, tile_c // 128, 128).sum(axis=1)
    out_ref[...] = acc


def asymmetric_loss(x, y, *, gamma_neg=4, gamma_pos=1, clip=0.05, eps=1e-8,
                    assume_binary_targets=True):
    """Scalar ASL loss = -sum over all elements (forward pass).

    `assume_binary_targets=True` uses an exact, cheaper path valid for y in
    {0, 1}; pass False for soft labels.
    """
    x = jnp.asarray(x)
    y = jnp.asarray(y)
    if x.ndim != 2:
        x = x.reshape(-1, x.shape[-1])
        y = y.reshape(-1, y.shape[-1])
    B, C = x.shape
    assert y.shape == (B, C)

    sub = max(_sublane_multiple(x.dtype), _sublane_multiple(y.dtype))

    # --- lane (class) tiling ---
    if C % 128 == 0:
        tile_c = 128
        for cand in range(min(C, 512), 127, -128):   # largest divisor <= 512
            if C % cand == 0:
                tile_c = cand
                break
        grid_c = C // tile_c
        fold_lanes = True
        out_lanes = 128
    else:
        # Full last dim as the block lane width: legal and avoids any pad copy.
        # TODO(synk): a huge C that is not a multiple of 128 cannot be lane-tiled
        # without padding; such shapes fall back to a single lane block.
        tile_c = C
        grid_c = 1
        fold_lanes = False
        out_lanes = C

    # --- row (batch) tiling: ~2 MiB f32-equivalent input blocks ---
    tile_b = min(1024, max(sub, (2 * 1024 * 1024) // (tile_c * 4)))
    tile_b -= tile_b % sub
    tile_b = max(tile_b, sub)
    tile_b = min(tile_b, _round_up(B, sub))           # never overshoot B by > sub
    if _cdiv(B, tile_b) < 2 and B >= 2 * sub:         # keep both v7x TCs fed
        tile_b = _round_up(_cdiv(B, 2), sub)
    grid_b = _cdiv(B, tile_b)
    needs_mask = (grid_b * tile_b != B)               # mask OOB rows in-kernel

    kernel = functools.partial(
        _asl_kernel,
        gamma_neg=gamma_neg, gamma_pos=gamma_pos, clip=clip, eps=eps,
        tile_b=tile_b, tile_c=tile_c, strip=sub, total_rows=B,
        needs_mask=needs_mask, fold_lanes=fold_lanes,
        binary_targets=assume_binary_targets)

    partials = pl.pallas_call(
        kernel,
        out_shape=jax.ShapeDtypeStruct((grid_b * 8, grid_c * out_lanes),
                                       jnp.float32),
        grid_spec=pltpu.PrefetchScalarGridSpec(
            num_scalar_prefetch=0,
            grid=(grid_b, grid_c),
            in_specs=[
                pl.BlockSpec((tile_b, tile_c), lambda i, j: (i, j)),
                pl.BlockSpec((tile_b, tile_c), lambda i, j: (i, j)),
            ],
            out_specs=pl.BlockSpec((8, out_lanes), lambda i, j: (i, j)),
        ),
        compiler_params=pltpu.CompilerParams(
            dimension_semantics=("parallel", "parallel"),
            vmem_limit_bytes=32 * 1024 * 1024),
    )(x, y)

    # Single tiny cross-lane reduction + negation in plain JAX.
    return -jnp.sum(partials)


def _asl_reference(x, y, gamma_neg=4, gamma_pos=1, clip=0.05, eps=1e-8):
    xs_pos = jax.nn.sigmoid(x)
    xs_neg = 1.0 - xs_pos
    if clip is not None and clip > 0:
        xs_neg = jnp.minimum(xs_neg + clip, 1.0)
    los_pos = y * jnp.log(jnp.maximum(xs_pos, eps))
    los_neg = (1.0 - y) * jnp.log(jnp.maximum(xs_neg, eps))
    loss = los_pos + los_neg
    pt = xs_pos * y + xs_neg * (1.0 - y)
    gamma = gamma_pos * y + gamma_neg * (1.0 - y)
    loss = loss * jnp.power(jnp.maximum(1.0 - pt, 0.0), gamma)
    return -jnp.sum(loss)


# TODO(synk): disable_torch_grad_focal_loss is an autograd-gating flag with no
# meaning in this forward-only kernel; it is intentionally not represented.

if __name__ == "__main__":
    key = jax.random.PRNGKey(0)
    kx, ky, ks = jax.random.split(key, 3)

    def check(name, x, y, **kw):
        out = jax.block_until_ready(asymmetric_loss(x, y, **kw))
        ref = _asl_reference(jnp.asarray(x, jnp.float32),
                             jnp.asarray(y, jnp.float32))
        assert jnp.allclose(out, ref, rtol=1e-4, atol=1e-3), (name, out, ref)

    # (a) aligned shapes, binary targets (fast path; B split across 2 blocks).
    B, C = 16, 128
    x = jax.random.normal(kx, (B, C), dtype=jnp.float32) * 2.0
    y = (jax.random.uniform(ky, (B, C)) > 0.7).astype(jnp.float32)
    check("aligned", x, y)

    # (b) unaligned B and C: no pad copy, in-kernel row masking, full-C lane block.
    B2, C2 = 10, 100
    x2 = jax.random.normal(kx, (B2, C2), dtype=jnp.float32) * 2.0
    y2 = (jax.random.uniform(ky, (B2, C2)) > 0.7).astype(jnp.float32)
    check("unaligned", x2, y2)

    # (c) soft labels -> general (non-binary) path.
    ysoft = jax.random.uniform(ks, (B2, C2))
    check("soft_labels", x2, ysoft, assume_binary_targets=False)

    # (d) bf16 inputs, wide C: 2-D grid (B and C both tiled), narrow-dtype stream.
    B3, C3 = 80, 1024
    x3 = (jax.random.normal(kx, (B3, C3), dtype=jnp.float32) * 2.0).astype(jnp.bfloat16)
    y3 = (jax.random.uniform(ky, (B3, C3)) > 0.7).astype(jnp.bfloat16)
    check("bf16_wide", x3, y3)

    print("KERNEL_OK")
</pallas_src>

<mosaic_0001>
module attributes {stable_mosaic.version = 11 : i64} {
  func.func @_asl_kernel(%arg0: i32, %arg1: i32, %arg2: memref<8x128xf32, #tpu.memory_space<vmem>>, %arg3: memref<8x128xf32, #tpu.memory_space<vmem>>, %arg4: memref<8x128xf32, #tpu.memory_space<vmem>>) attributes {dimension_semantics = [#tpu.dimension_semantics<parallel>, #tpu.dimension_semantics<parallel>], iteration_bounds = array<i64: 2, 1>, scalar_prefetch = 0 : i64, scratch_operands = 0 : i64, tpu.core_type = #tpu.core_type<tc>, window_params = [{transform_indices = @transform_0, window_bounds = array<i64: 8, 128>}, {transform_indices = @transform_1, window_bounds = array<i64: 8, 128>}, {transform_indices = @transform_2, window_bounds = array<i64: 8, 128>}]} {
    %cst = arith.constant 0.000000e+00 : f32
    %0 = vector.broadcast %cst : f32 to vector<8x128xf32>
    %c0_i32 = arith.constant 0 : i32
    %c8_i32 = arith.constant 8 : i32
    %1 = arith.muli %c0_i32, %c8_i32 : i32
    %2 = tpu.assume_multiple %1, 8 : i32
    %3 = arith.index_cast %2 : i32 to index
    %c0 = arith.constant 0 : index
    %4 = vector.load %arg2[%3, %c0] : memref<8x128xf32, #tpu.memory_space<vmem>>, vector<8x128xf32>
    %5 = arith.index_cast %2 : i32 to index
    %c0_0 = arith.constant 0 : index
    %6 = vector.load %arg3[%5, %c0_0] : memref<8x128xf32, #tpu.memory_space<vmem>>, vector<8x128xf32>
    %cst_1 = arith.constant 0.000000e+00 : f32
    %7 = vector.broadcast %cst_1 : f32 to vector<8x128xf32>
    %8 = arith.subf %7, %4 : vector<8x128xf32>
    %9 = math.exp %8 : vector<8x128xf32>
    %cst_2 = arith.constant 1.000000e+00 : f32
    %10 = vector.broadcast %cst_2 : f32 to vector<8x128xf32>
    %11 = arith.addf %10, %9 : vector<8x128xf32>
    %cst_3 = arith.constant 1.000000e+00 : f32
    %12 = vector.broadcast %cst_3 : f32 to vector<8x128xf32>
    %13 = arith.divf %12, %11 : vector<8x128xf32>
    %cst_4 = arith.constant 1.000000e+00 : f32
    %14 = vector.broadcast %cst_4 : f32 to vector<8x128xf32>
    %15 = arith.subf %14, %13 : vector<8x128xf32>
    %cst_5 = arith.constant 5.000000e-02 : f32
    %16 = vector.broadcast %cst_5 : f32 to vector<8x128xf32>
    %17 = arith.addf %15, %16 : vector<8x128xf32>
    %cst_6 = arith.constant 1.000000e+00 : f32
    %18 = vector.broadcast %cst_6 : f32 to vector<8x128xf32>
    %19 = arith.minimumf %17, %18 : vector<8x128xf32>
    %cst_7 = arith.constant 0.000000e+00 : f32
    %20 = vector.broadcast %cst_7 : f32 to vector<8x128xf32>
    %21 = arith.cmpf ogt, %6, %20 : vector<8x128xf32>
    %22 = arith.select %21, %13, %19 : vector<8x128xi1>, vector<8x128xf32>
    %cst_8 = arith.constant 9.99999993E-9 : f32
    %23 = vector.broadcast %cst_8 : f32 to vector<8x128xf32>
    %24 = arith.maximumf %22, %23 : vector<8x128xf32>
    %25 = math.log %24 : vector<8x128xf32>
    %cst_9 = arith.constant 1.000000e+00 : f32
    %26 = vector.broadcast %cst_9 : f32 to vector<8x128xf32>
    %27 = arith.subf %26, %22 : vector<8x128xf32>
    %cst_10 = arith.constant 0.000000e+00 : f32
    %28 = vector.broadcast %cst_10 : f32 to vector<8x128xf32>
    %29 = arith.maximumf %27, %28 : vector<8x128xf32>
    %30 = arith.mulf %29, %29 : vector<8x128xf32>
    %31 = arith.mulf %30, %30 : vector<8x128xf32>
    %32 = arith.select %21, %29, %31 : vector<8x128xi1>, vector<8x128xf32>
    %33 = arith.mulf %25, %32 : vector<8x128xf32>
    %34 = vector.shape_cast %33 : vector<8x128xf32> to vector<1x8x128xf32>
    %cst_11 = arith.constant dense<0.000000e+00> : vector<8x128xf32>
    %35 = vector.multi_reduction <add>, %34, %cst_11 [0] : vector<1x8x128xf32> to vector<8x128xf32>
    %36 = arith.addf %0, %35 : vector<8x128xf32>
    %c1_i32 = arith.constant 1 : i32
    %37 = vector.shape_cast %36 : vector<8x128xf32> to vector<8x1x128xf32>
    %cst_12 = arith.constant dense<0.000000e+00> : vector<8x128xf32>
    %38 = vector.multi_reduction <add>, %37, %cst_12 [1] : vector<8x1x128xf32> to vector<8x128xf32>
    %c0_13 = arith.constant 0 : index
    %c0_14 = arith.constant 0 : index
    %39 = vector.load %arg4[%c0_13, %c0_14] : memref<8x128xf32, #tpu.memory_space<vmem>>, vector<8x128xf32>
    tpu.vector_store %arg4[%c0_13, %c0_14], %38 {strides = array<i32>} : memref<8x128xf32, #tpu.memory_space<vmem>>, vector<8x128xf32>,
    return
  }
  func.func @transform_0(%arg0: i32, %arg1: i32) -> (i32, i32) {
    %c0_i32 = arith.constant 0 : i32
    return %arg0, %arg1 : i32, i32
  }
  func.func @transform_1(%arg0: i32, %arg1: i32) -> (i32, i32) {
    %c0_i32 = arith.constant 0 : i32
    return %arg0, %arg1 : i32, i32
  }
  func.func @transform_2(%arg0: i32, %arg1: i32) -> (i32, i32) {
    %c0_i32 = arith.constant 0 : i32
    return %arg0, %arg1 : i32, i32
  }
}

</mosaic_0001>

<bundles_post_ra>
// kernel: tpu_custom_call.1
= control target key start
LH: loop header
LB: loop body
LE: loop exit
PB: predicated region body
PF: predicated region fallthrough
CT: control target
= control target key end

     0   :  { %7 = vsyncpa [#allocation3], 0  ;;  %s841_s0 = inlined_call_operand.hbm [shape: f32[16,128], index: 0, kind: input, shape index: {}]   ;;  %s842_s1 = inlined_call_operand.hbm [shape: f32[16,128], index: 1, kind: input, shape index: {}]   ;;  %s843_s2 = inlined_call_operand.hbm [shape: f32[16,128], index: 2, kind: output, shape index: {}]  }
   0x1   :  { %9 = vsyncpa [#allocation3 + $0x1], 0 }
   0x2   :  { %10 = vsyncpa [#allocation6], 0 }
   0x3   :  { %12 = vsyncpa [#allocation6 + $0x1], 0 }
   0x4   :  { %13 = vsyncpa [#allocation4], 0 }
   0x5   :  { %15 = vsyncpa [#allocation4 + $0x1], 0  ;;  %s616_s9 = smov 0   ;;  %s618_s10 = smov 0  }
   0x6   :  { %s620_s11 = smov 0   ;;  %s622_s12 = smov 0  }
   0x7   :  { %s624_s13 = smov 0   ;;  %s626_s14 = smov 0  }
   0x8 LB: > { %s361_s15 = sadd.s32 4294967295, %s596_s14   ;;  %s362_s16 = sadd.s32 4294967294, %s596_s14   ;;  %s596_s14 = sphi %s626_s14, %s21_s14   ;;  %s592_s13 = sphi %s624_s13, %s863_s13   ;;  %s588_s12 = sphi %s622_s12, %s862_s12   ;;  %s584_s11 = sphi %s620_s11, %s861_s11   ;;  %s580_s10 = sphi %s618_s10, %s860_s10   ;;  %s576_s9 = sphi %s616_s9, %s859_s9  }
   0x9   : > { %s33_s17 = sadd.s32 1, %s592_s13  ;;  %s42_s18 = sadd.s32 1, %s584_s11 }
   0xa   : > { %p35_p0 = scmp.ge.s32.totalorder %s33_s17, 2  ;;  %p49_p1 = scmp.ne.s32.totalorder %s584_s11, %s580_s10 }
   0xb   : > { %p50_p2 = scmp.eq.s32.totalorder %s596_s14, 0  ;;  %p55_p3 = scmp.ne.s32.totalorder %s580_s10, %s576_s9 }
   0xc   : > { %s865_s17 = smov (%p35_p0, %s33_s17), 0  ;;  %p56_p5 = scmp.eq.s32.totalorder %s361_s15, 0 }
   0xd   : > { %p657_p4 = por %p50_p2, %p49_p1  ;;  %s37_s20 = ssub.s32 %s592_s13, %s865_s17 }
   0xe   : > { %p109_p6 = scmp.eq.s32.totalorder %s361_s15, 1  ;;  %p40_p7 = scmp.eq.s32.totalorder %s37_s20, 0 }
   0xf   : > { %p663_p8 = por %p56_p5, %p55_p3  ;;  %p115_p10 = scmp.eq.s32.totalorder %s362_s16, 1 }
  0x10   : > { %p667_p9 = por %p109_p6, %p49_p1  ;;  %p394_p13 = scmp.lt.s32.totalorder %s596_s14, 2 }
  0x11   : > { %s847_s21 = scalar_select %p663_p8, 1, 0 }
  0x12   : > { %s848_s22 = scalar_select %p667_p9, 1, 0 }
  0x13   : > { %s672_s23 = scalar_select %p40_p7, %s584_s11, %s42_s18  }
  0x14   : > { %p674_p11 = por %p115_p10, %p55_p3  ;;  %s681_s25 = sand.u32 1, %s584_s11  }
  0x15   : > { %s365_s26 = sshll.u32 %s681_s25, 3  ;;  %s366_s27 = sshll.u32 %s592_s13, 7 }
  0x16   : > { %s849_s24 = scalar_select %p674_p11, 1, 0 }
  0x17   : > { %s690_s30 = scalar_lea.hbm %s841_s0, %s366_s27  ;;  %s139_s3 = scalar_lea.vmem [#allocation2], %s365_s26 }
  0x18   : > { %s147_s4 = sshll.u32 %s139_s3, 4  ;;  %p698_p0 = pnand %p394_p13, %p657_p4  ;;  %s694_s4 = int_to_ptr.vmem [resolvable:$true] %s147_s4 }
  0x19   : > { %s136_s6 = scalar_lea.sflag [#allocation3], %s681_s25  ;;  %s450_s7 = scalar_lea.hbm %s690_s30, 128 }
  0x1a   : > { %p451_p3 = scmp.ne.s32.totalorder %s690_s30, %s450_s7  ;;  %p452_p5 = pneg %p698_p0 }
  0x1b   : > { %s455_s16 = scalar_lea.hbm %s841_s0, 256  ;;  %p456_p4 = scmp.lt.u32.totalorder %s690_s30, %s841_s0 }
  0x1c   : > { %p453_p6 = pnand %p452_p5, %p451_p3  ;;  %p457_p10 = scmp.lt.u32.totalorder %s455_s16, %s450_s7 }
  0x1d   : > { %p459_p12 = scmp.lt.u32.totalorder %s450_s7, %s690_s30 }
  0x1e   : > { %p454_p7 = pneg %p453_p6  ;;  %p458_p13 = por %p457_p10, %p456_p4 }
  0x20   : > { %p460_p1 = por %p459_p12, %p458_p13 }
  0x22   : > { %p461_p2 = pnand %p460_p1, %p454_p7 }
  0x24   : > { %464 = shalt.err (!%p461_p2)
}
  0x25   : > { %s465_s20 = scalar_lea.vmem %s694_s4, 128  ;;  %s598_s28 = smov [#allocation2]  }
  0x26   : > { %p466_p3 = scmp.ne.s32.totalorder %s694_s4, %s465_s20  ;;  %s470_s29 = sshll.u32 %s598_s28, 4  ;;  %s471_s29 = int_to_ptr.vmem [resolvable:$false] %s470_s29 }
  0x27   : > { %s472_s3 = scalar_lea.vmem %s471_s29, 256  ;;  %p473_p9 = scmp.lt.s32.totalorder %s694_s4, %s471_s29 }
  0x28   : > { %p468_p6 = pnand %p466_p3, %p452_p5  ;;  %p474_p4 = scmp.lt.s32.totalorder %s472_s3, %s465_s20 }
  0x2a   : > { %p469_p11 = pneg %p468_p6  ;;  %p475_p10 = por %p474_p4, %p473_p9 }
  0x2c   : > { %p476_p12 = pnand %p475_p10, %p469_p11 }
  0x2e   : > { %479 = shalt.err (!%p476_p12)
}
  0x2f   : > { %386 = dma.hbm_to_vmem [thread:$0]  (!%p698_p0), %s690_s30, 128, %s694_s4, %s136_s6  }
  0x30   : > { %p851_p1 = scmp.lt.s32.totalorder %s596_s14, 3  ;;  %p852_p2 = scmp.ge.s32.totalorder %s596_s14, 1 }
  0x31   : > { %s743_s16 = scalar_lea.hbm %s842_s1, %s366_s27  ;;  %s158_s18 = scalar_lea.vmem [#allocation5], %s365_s26 }
  0x32   : > { %p734_p7 = pnand %p852_p2, %p851_p1  ;;  %s166_s19 = sshll.u32 %s158_s18, 4  ;;  %s167_s19 = int_to_ptr.vmem [resolvable:$true] %s166_s19 }
  0x33   : > { %s155_s30 = scalar_lea.sflag [#allocation6], %s681_s25  ;;  %s480_s4 = scalar_lea.hbm %s743_s16, 128 }
  0x34   : > { %s853_s7 = scalar_select %p734_p7, 1, 0 }
  0x35   : > { %p481_p9 = scmp.ne.s32.totalorder %s743_s16, %s480_s4  ;;  %s485_s27 = scalar_lea.hbm %s842_s1, 256 }
  0x36   : > { %p486_p3 = scmp.lt.u32.totalorder %s743_s16, %s842_s1  ;;  %p487_p6 = scmp.lt.u32.totalorder %s485_s27, %s480_s4 }
  0x37   : > { %p483_p11 = pnand %p481_p9, %p452_p5  ;;  %p489_p10 = scmp.lt.u32.totalorder %s480_s4, %s743_s16 }
  0x38   : > { %p488_p4 = por %p487_p6, %p486_p3 }
  0x39   : > { %p484_p13 = pneg %p483_p11 }
  0x3a   : > { %p490_p12 = por %p489_p10, %p488_p4 }
  0x3c   : > { %p491_p1 = pnand %p490_p12, %p484_p13 }
  0x3e   : > { %494 = shalt.err (!%p491_p1)
}
  0x3f   : > { %s495_s25 = scalar_lea.vmem %s167_s19, 128  ;;  %s599_s26 = smov [#allocation5]  }
  0x40   : > { %p496_p2 = scmp.ne.s32.totalorder %s167_s19, %s495_s25  ;;  %s500_s3 = sshll.u32 %s599_s26, 4  ;;  %s501_s3 = int_to_ptr.vmem [resolvable:$false] %s500_s3 }
  0x41   : > { %s502_s8 = scalar_lea.vmem %s501_s3, 256  ;;  %p503_p8 = scmp.lt.s32.totalorder %s167_s19, %s501_s3 }
  0x42   : > { %p498_p9 = pnand %p496_p2, %p452_p5  ;;  %p504_p7 = scmp.lt.s32.totalorder %s502_s8, %s495_s25 }
  0x44   : > { %p499_p11 = pneg %p498_p9  ;;  %p505_p3 = por %p504_p7, %p503_p8 }
  0x46   : > { %p506_p6 = pnand %p505_p3, %p499_p11 }
  0x48   : > { %509 = shalt.err (!%p506_p6)
}
  0x49   : > { %389 = dma.hbm_to_vmem [thread:$0]  (!%p698_p0), %s743_s16, 128, %s167_s19, %s155_s30  }
  0x4a   : > { %p854_p13 = scmp.ne.s32.totalorder %s853_s7, 0 }
  0x4b   : > { %s770_s15 = sand.u32 (!%p854_p13), 1, %s580_s10   ;;  %p855_p8 = scmp.ne.s32.totalorder (!%p854_p13), %s847_s21, 0 }
  0x4c   : > { %175 = sbr.rel (%p854_p13) target bundleno = 153 (0x99), region = 28  ;;  %s773_s18 = sshll.u32 (!%p854_p13), %s770_s15, 3 }
  0x4d   : > { %s178_s4 = scalar_lea.sflag (!%p854_p13), [#allocation3], %s770_s15  ;;  %s181_s6 = scalar_lea.vmem (!%p854_p13), [#allocation2], %s773_s18 }
  0x53   : > { %563 = dma.done.wait (%p855_p8), %s178_s4, 128  }
  0x54   : > { %565 = vsyncadd (%p855_p8), %s178_s4, 4294967168  ;;  %s187_s5 = scalar_lea.sflag [#allocation6], %s770_s15  ;;  %s190_s7 = scalar_lea.vmem [#allocation5], %s773_s18 }
  0x55   : > { %567 = dma.done.wait (%p855_p8), %s187_s5, 128  }
  0x56   : > { %569 = vsyncadd (%p855_p8), %s187_s5, 4294967168  ;;  %v216_v0 = vld [vmem:[%s181_s6] sm:$0xff]  ;;  %v217_v6 = vld [vmem:[%s190_s7] sm:$0xff]  ;;  %s215_s21 = scalar_lea.vmem [#allocation7], %s773_s18  ;;  %s374_s19 = sshll.u32 %s588_s12, 7 }
  0x57   : > { %v218_v1 = vsub.f32 0.0, %v216_v0  ;;  %vm227_vm0 = vcmp.gt.f32.partialorder %v217_v6, 0.0  ;;  %s257_s16 = sshll.u32 %s215_s21, 4  ;;  %s794_s27 = scalar_lea.hbm %s843_s2, %s374_s19  ;;  %s789_s16 = int_to_ptr.vmem [resolvable:$true] %s257_s16 }
  0x58   : > { %s243_s28 = scalar_lea.sflag [#allocation4], %s770_s15  ;;  %s510_s29 = scalar_lea.vmem %s789_s16, 128 }
  0x59   : > { %v219_v2 = vmul.f32 1.442695, %v218_v1  ;;  %p511_p0 = scmp.ne.s32.totalorder %s789_s16, %s510_s29  ;;  %p856_p5 = scmp.ne.s32.totalorder %s848_s22, 0 }
  0x5a   : > { %s600_s12 = smov [#allocation7]  }
  0x5b   : > { %444 = vpow2.f32 %v219_v2  ;;  %p512_p7 = pnand %p511_p0, %p856_p5  ;;  %s514_s25 = sshll.u32 %s600_s12, 4  ;;  %s515_s25 = int_to_ptr.vmem [resolvable:$false] %s514_s25 }
  0x5c   : > { %s516_s26 = scalar_lea.vmem %s515_s25, 256  ;;  %p517_p10 = scmp.lt.s32.totalorder %s789_s16, %s515_s25 }
  0x5d   : > { %p513_p4 = pneg %p512_p7  ;;  %p518_p12 = scmp.lt.s32.totalorder %s516_s26, %s510_s29 }
  0x5f   : > { %p519_p1 = por %p518_p12, %p517_p10 }
  0x61   : > { %p520_p2 = pnand %p519_p1, %p513_p4 }
  0x65   : > { %v445_v3 = vpop.eup %444 }
  0x66   : > { %v221_v4 = vadd.f32 1.0, %v445_v3 }
  0x68   : > { %446 = vrcp.f32 %v221_v4 }
  0x72   : > { %v447_v5 = vpop.eup %446 }
  0x73   : > { %v224_v7 = vsub.f32 1.0, %v447_v5 }
  0x75   : > { %v225_v8 = vadd.f32 0.05, %v224_v7 }
  0x77   : > { %v226_v9 = vmin.f32 %v225_v8, 1.0 }
  0x79   : > { %v228_v10 = vsel %vm227_vm0, %v447_v5, %v226_v9 }
  0x7a   : > { %v229_v11 = vmax.f32 %v228_v10, 1e-08  ;;  %v232_v12 = vsub.f32 1.0, %v228_v10 }
  0x7c   : > { %448 = vlog2.f32 %v229_v11  ;;  %v233_v13 = vmax.f32 %v232_v12, 0.0 }
  0x7e   : > { %v234_v14 = vmul.f32 %v233_v13, %v233_v13 }
  0x80   : > { %v235_v15 = vmul.f32 %v234_v14, %v234_v14 }
  0x82   : > { %v236_v17 = vsel %vm227_vm0, %v233_v13, %v235_v15 }
  0x86   : > { %v449_v16 = vpop.eup %448 }
  0x87   : > { %v231_v18 = vmul.f32 0.6931472, %v449_v16 }
  0x89   : > { %v237_v19 = vmul.f32 %v236_v17, %v231_v18 }
  0x8b   : > { %241 = vst [vmem:[%s215_s21] sm:$0xff] %v237_v19 }
  0x8c   : > { %523 = shalt.err (!%p520_p2)
}
  0x8d   : > { %s524_s3 = scalar_lea.hbm %s794_s27, 128  ;;  %s528_s18 = scalar_lea.hbm %s843_s2, 256 }
  0x8e   : > { %p525_p9 = scmp.ne.s32.totalorder %s794_s27, %s524_s3  ;;  %p529_p6 = scmp.lt.u32.totalorder %s794_s27, %s843_s2 }
  0x8f   : > { %p530_p13 = scmp.lt.u32.totalorder %s528_s18, %s524_s3  ;;  %p532_p0 = scmp.lt.u32.totalorder %s524_s3, %s794_s27 }
  0x90   : > { %p526_p11 = pnand %p525_p9, %p856_p5 }
  0x91   : > { %p531_p8 = por %p530_p13, %p529_p6 }
  0x92   : > { %p527_p3 = pneg %p526_p11 }
  0x93   : > { %p533_p7 = por %p532_p0, %p531_p8 }
  0x95   : > { %p534_p4 = pnand %p533_p7, %p527_p3 }
  0x97   : > { %537 = shalt.err (!%p534_p4)
}
  0x98   : > { %381 = dma.vmem_to_hbm [thread:$0]  (%p856_p5), %s789_s16, 128, %s794_s27, %s243_s28  }
  0x99 PF: > { %s269_s5 = sand.u32 1, %s576_s9   ;;  %p857_p10 = scmp.ne.s32.totalorder %s849_s24, 0 }
  0x9a   : > { %p858_p12 = scmp.ge.s32.totalorder %s596_s14, 2  ;;  %s270_s7 = scalar_lea.sflag [#allocation4], %s269_s5 }
  0x9c   : > { %p391_p1 = pnand %p858_p12, %p857_p10 }
  0x9e   : > { %571 = dma.done.wait (!%p391_p1), %s270_s7, 128  }
  0x9f   : > { %573 = vsyncadd (!%p391_p1), %s270_s7, 4294967168  ;;  %s21_s14 = sadd.s32 1, %s596_s14   ;;  %s859_s9 = smov %s580_s10 }
  0xa0   : > { %p18_p2 = scmp.ge.s32.totalorder %s21_s14, 4   ;;  %s860_s10 = smov %s584_s11 }
  0xa1   : > { %s861_s11 = smov %s672_s23  ;;  %s862_s12 = smov %s592_s13 }
  0xa2   : > { %s863_s13 = smov %s865_s17  ;;  %20 = sbr.rel (!%p18_p2) target bundleno = 8 (0x8), region = 86 }
  0xa9   :  { %275 = vsyncpa [#allocation3], 1 }
  0xaa   :  { %277 = vsyncpa [#allocation3 + $0x1], 1 }
  0xab   :  { %278 = vsyncpa [#allocation6], 1 }
  0xac   :  { %280 = vsyncpa [#allocation6 + $0x1], 1 }
  0xad   :  { %281 = vsyncpa [#allocation4], 1 }
  0xae   :  { %283 = vsyncpa [#allocation4 + $0x1], 1 }

</bundles_post_ra>
